<compile_context>
chip_gen: v7x
topology: tpu7x:2x2x1
jax: 0.10.0
libtpu: 0.0.40
codegen_flags: <defaults>
</compile_context>

<pallas_src>
import jax
import jax.numpy as jnp
from jax.experimental import pallas as pl
from jax.experimental.pallas import tpu as pltpu


def _round_up(a, b):
    return ((a + b - 1) // b) * b


def _masked_l1_sum_kernel(uv_ref, gt_ref, m_ref, out_ref, acc_ref):
    """Per core p: out[p] = sum_{rows,lanes} mask * |uv - gt| (as a (1, L) slab)."""
    i = pl.program_id(1)

    @pl.when(i == 0)
    def _():
        acc_ref[...] = jnp.zeros_like(acc_ref)

    d = jnp.abs(uv_ref[...].astype(jnp.float32) - gt_ref[...].astype(jnp.float32))
    acc_ref[...] += d * m_ref[...].astype(jnp.float32)

    @pl.when(i == pl.num_programs(1) - 1)
    def _():
        # Single cross-sublane (XLU) reduction per core; lane-dense (1, L) store.
        out_ref[0] = jnp.sum(acc_ref[...], axis=0, keepdims=True)


def doc3d_uv_field_loss(uv_points, uv_gt, object_mask, *,
                        fwd_weight=1.0, loss_mode="l1", scinv_lambda=1.0,
                        num_cores=2, lanes=1024, max_sublanes=512):
    """JAX/Pallas equivalent of Doc3dUVFieldLoss.forward (loss_mode='l1').

    uv_points, uv_gt: (B, N, C) float (f32 or bf16 — accumulation is always f32).
    object_mask:      (B, N) bool / int.
    """
    if loss_mode != "l1":
        # TODO(synk): 'robust' mode (Barron robust_loss_pytorch.general.lossfun) not implemented.
        raise NotImplementedError("only loss_mode='l1' is implemented")
    del scinv_lambda  # scaleinv_loss is never called in forward()

    B, N, C = uv_points.shape
    assert uv_gt.shape == (B, N, C)
    assert object_mask.shape == (B, N)

    E = B * N * C                       # total number of uv scalars
    L = lanes                           # lane width per row (multiple of 128)
    P = num_cores                       # leading "parallel" grid axis (v7x megacore)

    rows = pl.cdiv(E, L)
    rows_per_core = pl.cdiv(rows, P)
    n_inner = max(1, pl.cdiv(rows_per_core, max_sublanes))
    # 32-row multiple keeps f32 (8,128), bf16 (16,128) and int8 (32,128) tiles aligned.
    S = _round_up(pl.cdiv(rows_per_core, n_inner), 32)
    rows_pad = P * n_inner * S
    E_pad = rows_pad * L

    def _to_tiles(x, dtype):
        flat = x.reshape(-1).astype(dtype)
        pad = E_pad - flat.shape[0]
        if pad:
            flat = jnp.concatenate([flat, jnp.zeros((pad,), dtype)])
        return flat.reshape(rows_pad, L)

    uv_tiles = _to_tiles(uv_points, uv_points.dtype)           # (rows_pad, L)
    gt_tiles = _to_tiles(uv_gt, uv_gt.dtype)                   # (rows_pad, L)
    # Per-element int8 mask (channel-broadcast in one small fused XLA op).
    mask_el = jnp.broadcast_to(object_mask[..., None], (B, N, C))
    mask_tiles = _to_tiles(mask_el, jnp.int8)                  # (rows_pad, L)

    row_map = lambda p, i: (p * n_inner + i, 0)

    itemsize = jnp.dtype(uv_points.dtype).itemsize
    bytes_accessed = 2 * E_pad * itemsize + E_pad + P * L * 4  # uv + gt + mask + out
    partials = pl.pallas_call(
        _masked_l1_sum_kernel,
        out_shape=jax.ShapeDtypeStruct((P, 1, L), jnp.float32),
        grid=(P, n_inner),
        in_specs=[
            pl.BlockSpec((S, L), row_map),
            pl.BlockSpec((S, L), row_map),
            pl.BlockSpec((S, L), row_map),
        ],
        out_specs=pl.BlockSpec((1, 1, L), lambda p, i: (p, 0, 0)),
        scratch_shapes=[pltpu.VMEM((S, L), jnp.float32)],
        compiler_params=pltpu.CompilerParams(
            dimension_semantics=("parallel", "arbitrary"),
            vmem_limit_bytes=32 * 1024 * 1024,
        ),
        cost_estimate=pl.CostEstimate(
            flops=4 * E_pad, transcendentals=0, bytes_accessed=bytes_accessed),
    )(uv_tiles, gt_tiles, mask_tiles)

    # nn.L1Loss(reduction='sum') normalized by mask.shape[0] * mask.shape[1].
    uv_loss = jnp.sum(partials) / float(B * N)
    loss = fwd_weight * uv_loss
    return {"loss": loss, "fwd_loss": uv_loss}


def _reference_loss(uv_points, uv_gt, object_mask, fwd_weight):
    # Pure-JAX reference of the PyTorch semantics.
    m = object_mask.astype(jnp.float32)[:, :, None]
    s = jnp.sum(jnp.abs(uv_points.astype(jnp.float32) - uv_gt.astype(jnp.float32)) * m)
    uv_loss = s / float(object_mask.shape[0] * object_mask.shape[1])
    return fwd_weight * uv_loss, uv_loss


if __name__ == "__main__":
    # Deterministic "module parameters" (no learned weights in this module).
    FWD_WEIGHT = 2.0
    LOSS_MODE = "l1"
    SCINV_LAMBDA = 1.0

    # Small shapes implied by the forward: uv_points (B, N, 2), mask (B, N).
    B, N, C = 2, 256, 2
    key = jax.random.PRNGKey(0)
    k1, k2, k3 = jax.random.split(key, 3)
    uv_points = jax.random.normal(k1, (B, N, C), dtype=jnp.float32)
    uv_gt = jax.random.normal(k2, (B, N, C), dtype=jnp.float32)
    object_mask = jax.random.bernoulli(k3, p=0.6, shape=(B, N))

    out = doc3d_uv_field_loss(
        uv_points, uv_gt, object_mask,
        fwd_weight=FWD_WEIGHT, loss_mode=LOSS_MODE, scinv_lambda=SCINV_LAMBDA,
    )
    jax.block_until_ready(out["loss"])

    ref_loss, ref_fwd = _reference_loss(uv_points, uv_gt, object_mask, FWD_WEIGHT)
    assert jnp.allclose(out["loss"], ref_loss, rtol=1e-5, atol=1e-5)
    assert jnp.allclose(out["fwd_loss"], ref_fwd, rtol=1e-5, atol=1e-5)

    print("KERNEL_OK")
</pallas_src>

<mosaic_0001>
module attributes {stable_mosaic.version = 11 : i64} {
  func.func @_masked_l1_sum_kernel(%arg0: i32, %arg1: i32, %arg2: memref<32x1024xf32, #tpu.memory_space<vmem>>, %arg3: memref<32x1024xf32, #tpu.memory_space<vmem>>, %arg4: memref<32x1024xi8, #tpu.memory_space<vmem>>, %arg5: memref<1x1x1024xf32, #tpu.memory_space<vmem>>, %arg6: memref<32x1024xf32, #tpu.memory_space<vmem>>) attributes {dimension_semantics = [#tpu.dimension_semantics<parallel>, #tpu.dimension_semantics<arbitrary>], iteration_bounds = array<i64: 2, 1>, scalar_prefetch = 0 : i64, scratch_operands = 1 : i64, tpu.core_type = #tpu.core_type<tc>, window_params = [{transform_indices = @transform_0, window_bounds = array<i64: 32, 1024>}, {transform_indices = @transform_1, window_bounds = array<i64: 32, 1024>}, {transform_indices = @transform_2, window_bounds = array<i64: 32, 1024>}, {transform_indices = @transform_3, window_bounds = array<i64: 1, 1, 1024>}]} {
    %c0_i32 = arith.constant 0 : i32
    %0 = arith.cmpi eq, %arg1, %c0_i32 : i32
    %1 = arith.extui %0 : i1 to i32
    %c0_i32_0 = arith.constant 0 : i32
    %2 = arith.cmpi ne, %1, %c0_i32_0 : i32
    scf.if %2 {
      %cst = arith.constant 0.000000e+00 : f32
      %16 = vector.broadcast %cst : f32 to vector<32x1024xf32>
      %c0_12 = arith.constant 0 : index
      %c0_13 = arith.constant 0 : index
      %17 = vector.load %arg6[%c0_12, %c0_13] : memref<32x1024xf32, #tpu.memory_space<vmem>>, vector<32x1024xf32>
      tpu.vector_store %arg6[%c0_12, %c0_13], %16 {strides = array<i32>} : memref<32x1024xf32, #tpu.memory_space<vmem>>, vector<32x1024xf32>,
    } else {
    }
    %c0 = arith.constant 0 : index
    %c0_1 = arith.constant 0 : index
    %3 = vector.load %arg2[%c0, %c0_1] : memref<32x1024xf32, #tpu.memory_space<vmem>>, vector<32x1024xf32>
    %c0_2 = arith.constant 0 : index
    %c0_3 = arith.constant 0 : index
    %4 = vector.load %arg3[%c0_2, %c0_3] : memref<32x1024xf32, #tpu.memory_space<vmem>>, vector<32x1024xf32>
    %5 = arith.subf %3, %4 : vector<32x1024xf32>
    %6 = math.absf %5 : vector<32x1024xf32>
    %c0_4 = arith.constant 0 : index
    %c0_5 = arith.constant 0 : index
    %7 = vector.load %arg6[%c0_4, %c0_5] : memref<32x1024xf32, #tpu.memory_space<vmem>>, vector<32x1024xf32>
    %c0_6 = arith.constant 0 : index
    %c0_7 = arith.constant 0 : index
    %8 = vector.load %arg4[%c0_6, %c0_7] : memref<32x1024xi8, #tpu.memory_space<vmem>>, vector<32x1024xi8>
    %9 = arith.sitofp %8 : vector<32x1024xi8> to vector<32x1024xf32>
    %10 = arith.mulf %6, %9 : vector<32x1024xf32>
    %11 = arith.addf %7, %10 : vector<32x1024xf32>
    %c0_8 = arith.constant 0 : index
    %c0_9 = arith.constant 0 : index
    %12 = vector.load %arg6[%c0_8, %c0_9] : memref<32x1024xf32, #tpu.memory_space<vmem>>, vector<32x1024xf32>
    tpu.vector_store %arg6[%c0_8, %c0_9], %11 {strides = array<i32>} : memref<32x1024xf32, #tpu.memory_space<vmem>>, vector<32x1024xf32>,
    %c0_i32_10 = arith.constant 0 : i32
    %13 = arith.cmpi eq, %arg1, %c0_i32_10 : i32
    %14 = arith.extui %13 : i1 to i32
    %c0_i32_11 = arith.constant 0 : i32
    %15 = arith.cmpi ne, %14, %c0_i32_11 : i32
    scf.if %15 {
      %c0_12 = arith.constant 0 : index
      %c0_13 = arith.constant 0 : index
      %16 = vector.load %arg6[%c0_12, %c0_13] : memref<32x1024xf32, #tpu.memory_space<vmem>>, vector<32x1024xf32>
      %cst = arith.constant dense<0.000000e+00> : vector<1024xf32>
      %17 = vector.multi_reduction <add>, %16, %cst [0] : vector<32x1024xf32> to vector<1024xf32>
      %18 = vector.shape_cast %17 : vector<1024xf32> to vector<1x1024xf32>
      %c0_14 = arith.constant 0 : index
      %c0_15 = arith.constant 0 : index
      %c0_16 = arith.constant 0 : index
      %19 = vector.load %arg5[%c0_14, %c0_15, %c0_16] : memref<1x1x1024xf32, #tpu.memory_space<vmem>>, vector<1x1x1024xf32>
      %20 = vector.shape_cast %19 : vector<1x1x1024xf32> to vector<1x1024xf32>
      %21 = vector.shape_cast %18 : vector<1x1024xf32> to vector<1x1x1024xf32>
      tpu.vector_store %arg5[%c0_14, %c0_15, %c0_16], %21 {strides = array<i32>} : memref<1x1x1024xf32, #tpu.memory_space<vmem>>, vector<1x1x1024xf32>,
    } else {
    }
    return
  }
  func.func @transform_0(%arg0: i32, %arg1: i32) -> (i32, i32) {
    %c1_i32 = arith.constant 1 : i32
    %0 = arith.muli %arg0, %c1_i32 : i32
    %1 = arith.addi %0, %arg1 : i32
    %c0_i32 = arith.constant 0 : i32
    %c0_i32_0 = arith.constant 0 : i32
    return %1, %c0_i32 : i32, i32
  }
  func.func @transform_1(%arg0: i32, %arg1: i32) -> (i32, i32) {
    %c1_i32 = arith.constant 1 : i32
    %0 = arith.muli %arg0, %c1_i32 : i32
    %1 = arith.addi %0, %arg1 : i32
    %c0_i32 = arith.constant 0 : i32
    %c0_i32_0 = arith.constant 0 : i32
    return %1, %c0_i32 : i32, i32
  }
  func.func @transform_2(%arg0: i32, %arg1: i32) -> (i32, i32) {
    %c1_i32 = arith.constant 1 : i32
    %0 = arith.muli %arg0, %c1_i32 : i32
    %1 = arith.addi %0, %arg1 : i32
    %c0_i32 = arith.constant 0 : i32
    %c0_i32_0 = arith.constant 0 : i32
    return %1, %c0_i32 : i32, i32
  }
  func.func @transform_3(%arg0: i32, %arg1: i32) -> (i32, i32, i32) {
    %c0_i32 = arith.constant 0 : i32
    %c0_i32_0 = arith.constant 0 : i32
    %c0_i32_1 = arith.constant 0 : i32
    return %arg0, %c0_i32, %c0_i32_0 : i32, i32, i32
  }
}

</mosaic_0001>

<bundles_post_ra>
// kernel: tpu_custom_call.1
= control target key start
LH: loop header
LB: loop body
LE: loop exit
PB: predicated region body
PF: predicated region fallthrough
CT: control target
= control target key end

     0   :  { %s1839_s0 = inlined_call_operand.hbm [shape: f32[64,1024], index: 0, kind: input, shape index: {}]   ;;  %s1840_s1 = inlined_call_operand.hbm [shape: f32[64,1024], index: 1, kind: input, shape index: {}]   ;;  %s1841_s2 = inlined_call_operand.hbm [shape: s8[64,1024], index: 2, kind: input, shape index: {}]   ;;  %s1842_s3 = inlined_call_operand.hbm [shape: f32[2,1,1024], index: 3, kind: output, shape index: {}]  }
   0x1   :  { %1854 = sst [smem:[#allocation39_spill]] %s1839_s0 }
   0x2   :  { %1855 = sst [smem:[#allocation40_spill]] %s1840_s1 }
   0x3   :  { %8 = vsyncpa [#allocation4], 0 }
   0x4   :  { %10 = vsyncpa [#allocation4 + $0x1], 0 }
   0x5   :  { %11 = vsyncpa [#allocation7], 0 }
   0x6   :  { %13 = vsyncpa [#allocation7 + $0x1], 0 }
   0x7   :  { %14 = vsyncpa [#allocation5], 0 }
   0x8   :  { %16 = vsyncpa [#allocation5 + $0x1], 0  ;;  %s1272_s12 = smov 0   ;;  %s1274_s13 = smov 0  }
   0x9   :  { %s1276_s14 = smov 0   ;;  %s1278_s15 = smov 0  }
   0xa   :  { %s1280_s16 = smov 0   ;;  %s1282_s17 = smov 0  }
   0xb LB: > { %1856 = sst [smem:[#allocation13_spill]] %s1231_s14  ;;  %s1303_s18 = sadd.s32 4294967295, %s1243_s17   ;;  %s1243_s17 = sphi %s1282_s17, %s22_s17   ;;  %s1239_s16 = sphi %s1280_s16, %s1930_s16   ;;  %s1235_s15 = sphi %s1278_s15, %s1929_s15   ;;  %s1231_s14 = sphi %s1276_s14, %s1925_s14   ;;  %s1227_s13 = sphi %s1274_s13, %s1928_s13   ;;  %s1223_s12 = sphi %s1272_s12, %s1927_s12  }
   0xc   : > { %1857 = sst [smem:[#allocation14_spill]] %s1243_s17  ;;  %s962_s19 = sadd.s32 4294967294, %s1243_s17  }
   0xd   : > { %s34_s20 = sadd.s32 1, %s1239_s16  ;;  %s43_s21 = sadd.s32 1, %s1231_s14 }
   0xe   : > { %p36_p0 = scmp.ge.s32.totalorder %s34_s20, 2  ;;  %p50_p1 = scmp.ne.s32.totalorder %s1231_s14, %s1227_s13 }
   0xf   : > { %p51_p2 = scmp.eq.s32.totalorder %s1243_s17, 0  ;;  %p56_p3 = scmp.ne.s32.totalorder %s1227_s13, %s1223_s12 }
  0x10   : > { %s1932_s20 = smov (%p36_p0, %s34_s20), 0  ;;  %p57_p5 = scmp.eq.s32.totalorder %s1303_s18, 0 }
  0x11   : > { %1858 = sst [smem:[#allocation15_spill]] %s1932_s20  ;;  %p1315_p4 = por %p51_p2, %p50_p1 }
  0x12   : > { %s40_s23 = ssub.s32 %s1239_s16, %s1932_s20  ;;  %p136_p6 = scmp.eq.s32.totalorder %s1303_s18, 1 }
  0x13   : > { %p41_p7 = scmp.eq.s32.totalorder %s40_s23, 0  ;;  %p1323_p8 = por %p57_p5, %p56_p3 }
  0x14   : > { %p1327_p9 = por %p136_p6, %p50_p1  ;;  %p142_p10 = scmp.eq.s32.totalorder %s962_s19, 1 }
  0x15   : > { %s1860_s24 = scalar_select %p1323_p8, 1, 0 }
  0x16   : > { %s1861_s25 = scalar_select %p1327_p9, 1, 0 }
  0x17   : > { %s1332_s26 = scalar_select %p41_p7, %s1231_s14, %s43_s21  }
  0x18   : > { %p1334_p11 = por %p142_p10, %p56_p3  ;;  %p1014_p13 = scmp.lt.s32.totalorder %s1243_s17, 2 }
  0x19   : > { %1862 = sst [smem:[#allocation16_spill]] %s1332_s26  ;;  %s1341_s28 = sand.u32 1, %s1231_s14  }
  0x1a   : > { %s1863_s27 = scalar_select %p1334_p11, 1, 0 }
  0x1b   : > { %s965_s29 = sshll.u32 %s1341_s28, 8  ;;  %s987_s30 = sshll.u32 %s1239_s16, 12 }
  0x1c   : > { %1864 = sst [smem:[#allocation17_spill]] %s1863_s27  ;;  %p1347_p0 = pnand %p1014_p13, %p1315_p4 }
  0x1d   : > { %s185_s5 = sand.u32 1, %s1243_s17   ;;  %s1866_s1 = sld [smem:[#allocation40_spill]] }
  0x1e   : > { %s1865_s4 = scalar_select %p1347_p0, 1, 0 }
  0x1f   : > { %s189_s9 = scalar_lea.vmem [#allocation6], %s965_s29  ;;  %s1365_s11 = scalar_lea.sflag [#allocation7], %s185_s5 }
  0x20   : > { %s198_s10 = sshll.u32 %s189_s9, 4  ;;  %p1371_p4 = pneg %p1347_p0  ;;  %s1362_s10 = int_to_ptr.vmem [resolvable:$true] %s198_s10 }
  0x23   : > { %s1357_s8 = scalar_lea.hbm %s1866_s1, %s987_s30  ;;  %s1072_s6 = scalar_lea.hbm %s1866_s1, 8192 }
  0x24   : > { %s1067_s19 = scalar_lea.hbm %s1357_s8, 4096  ;;  %p1073_p7 = scmp.lt.u32.totalorder %s1357_s8, %s1866_s1 }
  0x25   : > { %p1068_p3 = scmp.ne.s32.totalorder %s1357_s8, %s1067_s19  ;;  %p1074_p10 = scmp.lt.u32.totalorder %s1072_s6, %s1067_s19 }
  0x26   : > { %p1076_p12 = scmp.lt.u32.totalorder %s1067_s19, %s1357_s8 }
  0x27   : > { %p1070_p5 = pnand %p1371_p4, %p1068_p3  ;;  %p1075_p13 = por %p1074_p10, %p1073_p7 }
  0x29   : > { %p1071_p6 = pneg %p1070_p5  ;;  %p1077_p1 = por %p1076_p12, %p1075_p13 }
  0x2b   : > { %p1078_p2 = pnand %p1077_p1, %p1071_p6 }
  0x2d   : > { %1081 = shalt.err (!%p1078_p2)
}
  0x2e   : > { %s1082_s5 = scalar_lea.vmem %s1362_s10, 4096  ;;  %s1245_s22 = smov [#allocation6]  }
  0x2f   : > { %p1083_p3 = scmp.ne.s32.totalorder %s1362_s10, %s1082_s5  ;;  %s1087_s23 = sshll.u32 %s1245_s22, 4  ;;  %s1088_s23 = int_to_ptr.vmem [resolvable:$false] %s1087_s23 }
  0x30   : > { %s1089_s7 = scalar_lea.vmem %s1088_s23, 8192  ;;  %p1090_p9 = scmp.lt.s32.totalorder %s1362_s10, %s1088_s23 }
  0x31   : > { %p1085_p5 = pnand %p1083_p3, %p1371_p4  ;;  %p1091_p8 = scmp.lt.s32.totalorder %s1089_s7, %s1082_s5 }
  0x33   : > { %p1086_p11 = pneg %p1085_p5  ;;  %p1092_p7 = por %p1091_p8, %p1090_p9 }
  0x35   : > { %p1093_p10 = pnand %p1092_p7, %p1086_p11 }
  0x37   : > { %1096 = shalt.err (!%p1093_p10)
}
  0x38   : > { %s1845_s19 = smov 1024   ;;  %s1846_s6 = smov 64  }
  0x39   : > { %1006 = dma.hbm_to_vmem [thread:$0]  (!%p1347_p0), %s1357_s8, 4096, %s1362_s10, %s1365_s11, %s1845_s19, %s1845_s19, %s1846_s6  }
  0x3a   : > { %p1868_p8 = scmp.lt.s32.totalorder %s1243_s17, 3  ;;  %p1869_p9 = scmp.ge.s32.totalorder %s1243_s17, 1 }
  0x3b   : > { %s1871_s0 = sld [smem:[#allocation39_spill]]  ;;  %s166_s7 = scalar_lea.vmem [#allocation3], %s965_s29 }
  0x3c   : > { %p1402_p11 = pnand %p1869_p9, %p1868_p8  ;;  %s175_s1 = sshll.u32 %s166_s7, 4  ;;  %s1416_s1 = int_to_ptr.vmem [resolvable:$true] %s175_s1 }
  0x3d   : > { %s973_s8 = sshll.u32 %s1341_s28, 6  ;;  %s163_s10 = scalar_lea.sflag [#allocation4], %s1341_s28 }
  0x3e   : > { %s1870_s9 = scalar_select %p1402_p11, 1, 0 }
  0x41   : > { %s1411_s23 = scalar_lea.hbm %s1871_s0, %s987_s30  ;;  %s1102_s30 = scalar_lea.hbm %s1871_s0, 8192 }
  0x42   : > { %s1097_s19 = scalar_lea.hbm %s1411_s23, 4096  ;;  %p1103_p6 = scmp.lt.u32.totalorder %s1411_s23, %s1871_s0 }
  0x43   : > { %p1098_p12 = scmp.ne.s32.totalorder %s1411_s23, %s1097_s19  ;;  %p1104_p13 = scmp.lt.u32.totalorder %s1102_s30, %s1097_s19 }
  0x44   : > { %p1106_p5 = scmp.lt.u32.totalorder %s1097_s19, %s1411_s23 }
  0x45   : > { %p1100_p1 = pnand %p1098_p12, %p1371_p4  ;;  %p1105_p3 = por %p1104_p13, %p1103_p6 }
  0x47   : > { %p1101_p2 = pneg %p1100_p1  ;;  %p1107_p7 = por %p1106_p5, %p1105_p3 }
  0x49   : > { %p1108_p10 = pnand %p1107_p7, %p1101_p2 }
  0x4b   : > { %1111 = shalt.err (!%p1108_p10)
}
  0x4c   : > { %s1112_s29 = scalar_lea.vmem %s1416_s1, 4096  ;;  %s1248_s6 = smov [#allocation3]  }
  0x4d   : > { %p1113_p8 = scmp.ne.s32.totalorder %s1416_s1, %s1112_s29  ;;  %s1117_s7 = sshll.u32 %s1248_s6, 4  ;;  %s1118_s7 = int_to_ptr.vmem [resolvable:$false] %s1117_s7 }
  0x4e   : > { %s1119_s20 = scalar_lea.vmem %s1118_s7, 8192  ;;  %p1120_p1 = scmp.lt.s32.totalorder %s1416_s1, %s1118_s7 }
  0x4f   : > { %p1115_p9 = pnand %p1113_p8, %p1371_p4  ;;  %p1121_p11 = scmp.lt.s32.totalorder %s1119_s20, %s1112_s29 }
  0x51   : > { %p1116_p12 = pneg %p1115_p9  ;;  %p1122_p6 = por %p1121_p11, %p1120_p1 }
  0x53   : > { %p1123_p13 = pnand %p1122_p6, %p1116_p12 }
  0x55   : > { %1126 = shalt.err (!%p1123_p13)
}
  0x56   : > { %s1872_s19 = smov 64   ;;  %s1873_s5 = smov 1024  }
  0x57   : > { %1003 = dma.hbm_to_vmem [thread:$0]  (!%p1347_p0), %s1411_s23, 4096, %s1416_s1, %s163_s10, %s1873_s5, %s1873_s5, %s1872_s19  }
  0x58   : > { %s990_s30 = sshll.u32 %s1239_s16, 10  ;;  %s212_s22 = scalar_lea.vmem [#allocation8], %s973_s8 }
  0x59   : > { %s221_s29 = sshll.u32 %s212_s22, 4  ;;  %s219_s20 = scalar_lea.hbm %s1841_s2, %s990_s30  ;;  %s222_s29 = int_to_ptr.vmem [resolvable:$true] %s221_s29 }
  0x5a   : > { %s1127_s0 = scalar_lea.hbm %s219_s20, 1024  ;;  %s1132_s17 = scalar_lea.hbm %s1841_s2, 2048 }
  0x5b   : > { %p1128_p11 = scmp.ne.s32.totalorder %s219_s20, %s1127_s0  ;;  %p1133_p5 = scmp.lt.u32.totalorder %s219_s20, %s1841_s2 }
  0x5c   : > { %p1134_p7 = scmp.lt.u32.totalorder %s1132_s17, %s1127_s0  ;;  %p1136_p8 = scmp.lt.u32.totalorder %s1127_s0, %s219_s20 }
  0x5d   : > { %p1130_p2 = pnand %p1128_p11, %p1371_p4 }
  0x5e   : > { %p1135_p10 = por %p1134_p7, %p1133_p5 }
  0x5f   : > { %p1131_p3 = pneg %p1130_p2 }
  0x60   : > { %p1137_p9 = por %p1136_p8, %p1135_p10 }
  0x62   : > { %p1138_p12 = pnand %p1137_p9, %p1131_p3 }
  0x64   : > { %1141 = shalt.err (!%p1138_p12)
}
  0x65   : > { %s1142_s28 = scalar_lea.vmem %s222_s29, 1024  ;;  %s1249_s23 = smov [#allocation8]  }
  0x66   : > { %p1143_p1 = scmp.ne.s32.totalorder %s222_s29, %s1142_s28  ;;  %s1147_s8 = sshll.u32 %s1249_s23, 4  ;;  %s1148_s8 = int_to_ptr.vmem [resolvable:$false] %s1147_s8 }
  0x67   : > { %s1149_s14 = scalar_lea.vmem %s1148_s8, 2048  ;;  %p1150_p11 = scmp.lt.s32.totalorder %s222_s29, %s1148_s8 }
  0x68   : > { %p1145_p6 = pnand %p1143_p1, %p1371_p4  ;;  %p1151_p2 = scmp.lt.s32.totalorder %s1149_s14, %s1142_s28 }
  0x6a   : > { %p1146_p13 = pneg %p1145_p6  ;;  %p1152_p0 = por %p1151_p2, %p1150_p11 }
  0x6c   : > { %p1153_p5 = pnand %p1152_p0, %p1146_p13 }
  0x6e   : > { %1156 = shalt.err (!%p1153_p5)
}
  0x6f   : > { %p1874_p7 = scmp.ne.s32.totalorder %s1865_s4, 0  ;;  %p1875_p3 = scmp.ne.s32.totalorder %s1870_s9, 0 }
  0x71   : > { %1009 = dma.hbm_to_vmem [thread:$0]  (!%p1874_p7), %s219_s20, 1024, %s222_s29, %s1365_s11  }
  0x72   : > { %230 = sbr.rel (%p1875_p3) target bundleno = 222 (0xde), region = 32 }
  0x79   : > { %s1467_s0 = sand.u32 1, %s1227_s13   ;;  %p1876_p4 = scmp.ne.s32.totalorder %s1860_s24, 0 }
  0x7a   : > { %s977_s17 = sshll.u32 %s1467_s0, 8  ;;  %s233_s26 = scalar_lea.sflag [#allocation4], %s1467_s0 }
  0x7b   : > { %s1471_s27 = scalar_lea.vmem [#allocation3], %s977_s17 }
  0x7c   : > { %1210 = dma.done.wait (%p1876_p4), %s233_s26, 4096  }
  0x7d   : > { %1212 = vsyncadd (%p1876_p4), %s233_s26, 4294963200  ;;  %s241_s4 = sand.u32 1, %s1303_s18   ;;  %s1478_s21 = scalar_lea.vmem [#allocation6], %s977_s17 }
  0x7e   : > { %s242_s11 = scalar_lea.sflag [#allocation7], %s241_s4 }
  0x7f   : > { %1214 = dma.done.wait (%p1876_p4), %s242_s11, 5120  }
  0x80   : > { %1216 = vsyncadd (%p1876_p4), %s242_s11, 4294962176  ;;  %v1250_v0 = vmov 1966171168   ;;  %v778_v2 = vlaneseq  ;;  %v328_v3 = vld [vmem:[%s1471_s27] sm:$0xff]  ;;  %v329_v4 = vld [vmem:[%s1471_s27 + $0x8] sm:$0xff]  ;;  %s979_s18 = sshll.u32 %s1467_s0, 6 }
  0x81   : > { %v776_v1 = vunpack.c.l.s4 %v1250_v0  ;;  %v330_v5 = vld [vmem:[%s1471_s27 + $0x10] sm:$0xff]  ;;  %v1488_v6 = vld [vmem:[%s1471_s27 + $0x18] sm:$0xff]  ;;  %v1491_v7 = vld [vmem:[%s1471_s27 + $0x20] sm:$0xff]  ;;  %s1678_s24 = scalar_lea.vmem [#allocation8], %s979_s18  ;;  %s980_s9 = sshll.u32 %s1467_s0, 3 }
  0x82   : > { %v1494_v8 = vld [vmem:[%s1471_s27 + $0x28] sm:$0xff]  ;;  %v1497_v9 = vld [vmem:[%s1471_s27 + $0x30] sm:$0xff]  ;;  %v779_v11 = vshrl.u32 %v778_v2, 7  ;;  %v1500_v12 = vld [vmem:[%s1471_s27 + $0x38] sm:$0xff]  ;;  %s991_s10 = sshll.u32 %s1235_s15, 7  ;;  %s286_s19 = scalar_lea.vmem [#allocation9], %s980_s9 }
  0x83   : > { %v777_v10 = vunpack.c.0.s8 %v776_v1  ;;  %v1503_v13 = vld [vmem:[%s1471_s27 + $0x40] sm:$0xff]  ;;  %v1506_v14 = vld [vmem:[%s1471_s27 + $0x48] sm:$0xff]  ;;  %v1509_v15 = vld [vmem:[%s1471_s27 + $0x50] sm:$0xff]  ;;  %s837_s5 = sshll.u32 %s286_s19, 4  ;;  %s1790_s29 = scalar_lea.hbm %s1842_s3, %s991_s10  ;;  %s1792_s5 = int_to_ptr.vmem [resolvable:$true] %s837_s5 }
  0x84   : > { %v1512_v16 = vld [vmem:[%s1471_s27 + $0x58] sm:$0xff]  ;;  %v1515_v17 = vld [vmem:[%s1471_s27 + $0x60] sm:$0xff]  ;;  %v1519_v19 = vld [vmem:[%s1471_s27 + $0x68] sm:$0xff]  ;;  %s823_s6 = scalar_lea.sflag [#allocation5], %s1467_s0  ;;  %s1157_s7 = scalar_lea.vmem %s1792_s5, 128 }
  0x85   : > { %v360_v18 = vld [vmem:[%s1478_s21] sm:$0xff]  ;;  %v1522_v20 = vld [vmem:[%s1471_s27 + $0x70] sm:$0xff]  ;;  %v1525_v21 = vld [vmem:[%s1471_s27 + $0x78] sm:$0xff]  ;;  %v1545_v35 = vsub.s32 %v777_v10, %v779_v11  ;;  %p1158_p0 = scmp.ne.s32.totalorder %s1792_s5, %s1157_s7  ;;  %p1919_p10 = scmp.ne.s32.totalorder %s1861_s25, 0 }
  0x86   : > { %v361_v22 = vld [vmem:[%s1478_s21 + $0x8] sm:$0xff]  ;;  %v362_v23 = vld [vmem:[%s1478_s21 + $0x10] sm:$0xff]  ;;  %v363_v24 = vld [vmem:[%s1478_s21 + $0x18] sm:$0xff]  ;;  %v392_v25 = vsub.f32 %v328_v3, %v360_v18  ;;  %s1251_s15 = smov [#allocation9]  }
  0x87   : > { %v1531_v26 = vld [vmem:[%s1471_s27 + $0x80] sm:$0xff]  ;;  %v1534_v27 = vld [vmem:[%s1471_s27 + $0x88] sm:$0xff]  ;;  %v1537_v28 = vld [vmem:[%s1471_s27 + $0x90] sm:$0xff]  ;;  %v393_v32 = vsub.f32 %v329_v4, %v361_v22  ;;  %v394_v33 = vsub.f32 %v330_v5, %v362_v23  ;;  %v395_v34 = vsub.f32 %v1488_v6, %v363_v24  ;;  %1877 = vst [vmem:[#allocation18_spill] sm:$0xff] %v1545_v35  ;;  %p1159_p8 = pnand %p1158_p0, %p1919_p10  ;;  %s1161_s20 = sshll.u32 %s1251_s15, 4  ;;  %s1162_s20 = int_to_ptr.vmem [resolvable:$false] %s1161_s20 }
  0x88   : > { %v364_v29 = vld [vmem:[%s1478_s21 + $0x20] sm:$0xff]  ;;  %v365_v30 = vld [vmem:[%s1478_s21 + $0x28] sm:$0xff]  ;;  %v1542_v31 = vld [vmem:[%s1478_s21 + $0x30] sm:$0xff]  ;;  %v1569_v45 = vand.u32 2147483647, %v392_v25  ;;  %s1163_s1 = scalar_lea.vmem %s1162_s20, 256  ;;  %p1164_p12 = scmp.lt.s32.totalorder %s1792_s5, %s1162_s20 }
  0x89   : > { %v1548_v36 = vld [vmem:[%s1471_s27 + $0x98] sm:$0xff]  ;;  %v1551_v37 = vld [vmem:[%s1471_s27 + $0xa0] sm:$0xff]  ;;  %v1554_v38 = vld [vmem:[%s1471_s27 + $0xa8] sm:$0xff]  ;;  %v396_v42 = vsub.f32 %v1491_v7, %v364_v29  ;;  %v397_v43 = vsub.f32 %v1494_v8, %v365_v30  ;;  %v398_v44 = vsub.f32 %v1497_v9, %v1542_v31  ;;  %v1595_v55 = vand.u32 2147483647, %v393_v32  ;;  %p1160_p9 = pneg %p1159_p8  ;;  %p1165_p1 = scmp.lt.s32.totalorder %s1163_s1, %s1157_s7 }
  0x8a   : > { %v1557_v39 = vld [vmem:[%s1478_s21 + $0x38] sm:$0xff]  ;;  %v1560_v40 = vld [vmem:[%s1478_s21 + $0x40] sm:$0xff]  ;;  %v1563_v41 = vld [vmem:[%s1478_s21 + $0x48] sm:$0xff]  ;;  %v1616_v1 = vand.u32 2147483647, %v394_v33 }
  0x8b   : > { %v1572_v46 = vld [vmem:[%s1471_s27 + $0xb0] sm:$0xff]  ;;  %v1575_v47 = vld [vmem:[%s1471_s27 + $0xb8] sm:$0xff]  ;;  %v1578_v48 = vld [vmem:[%s1471_s27 + $0xc0] sm:$0xff]  ;;  %v399_v52 = vsub.f32 %v1500_v12, %v1557_v39  ;;  %v400_v53 = vsub.f32 %v1503_v13, %v1560_v40  ;;  %v401_v54 = vsub.f32 %v1506_v14, %v1563_v41  ;;  %v1633_v11 = vand.u32 2147483647, %v395_v34  ;;  %p1166_p6 = por %p1165_p1, %p1164_p12 }
  0x8c   : > { %v1581_v49 = vld [vmem:[%s1478_s21 + $0x50] sm:$0xff]  ;;  %v1584_v50 = vld [vmem:[%s1478_s21 + $0x58] sm:$0xff]  ;;  %v1587_v51 = vld [vmem:[%s1478_s21 + $0x60] sm:$0xff]  ;;  %v1660_v33 = vand.u32 2147483647, %v398_v44 }
  0x8d   : > { %v1599_v56 = vld [vmem:[%s1471_s27 + $0xc8] sm:$0xff]  ;;  %v1602_v57 = vld [vmem:[%s1471_s27 + $0xd0] sm:$0xff]  ;;  %v1605_v58 = vld [vmem:[%s1471_s27 + $0xd8] sm:$0xff]  ;;  %v402_v62 = vsub.f32 %v1509_v15, %v1581_v49  ;;  %v403_v63 = vsub.f32 %v1512_v16, %v1584_v50  ;;  %v404_v0 = vsub.f32 %v1515_v17, %v1587_v51  ;;  %v1668_v41 = vand.u32 2147483647, %v399_v52  ;;  %p1167_p13 = pnand %p1166_p6, %p1160_p9 }
  0x8e   : > { %v373_v59 = vld [vmem:[%s1478_s21 + $0x68] sm:$0xff]  ;;  %v374_v60 = vld [vmem:[%s1478_s21 + $0x70] sm:$0xff]  ;;  %v375_v61 = vld [vmem:[%s1478_s21 + $0x78] sm:$0xff]  ;;  %v1674_v44 = vand.u32 2147483647, %v400_v53 }
  0x8f   : > { %v1619_v2 = vld [vmem:[%s1471_s27 + $0xe0] sm:$0xff]  ;;  %v1622_v3 = vld [vmem:[%s1471_s27 + $0xe8] sm:$0xff]  ;;  %v1625_v4 = vld [vmem:[%s1471_s27 + $0xf0] sm:$0xff]  ;;  %v405_v8 = vsub.f32 %v1519_v19, %v373_v59  ;;  %v406_v9 = vsub.f32 %v1522_v20, %v374_v60  ;;  %v407_v10 = vsub.f32 %v1525_v21, %v375_v61  ;;  %v1644_v19 = vand.u32 2147483647, %v396_v42 }
  0x90   : > { %v376_v5 = vld [vmem:[%s1478_s21 + $0x80] sm:$0xff]  ;;  %v377_v6 = vld [vmem:[%s1478_s21 + $0x88] sm:$0xff]  ;;  %v378_v7 = vld [vmem:[%s1478_s21 + $0x90] sm:$0xff]  ;;  %v1687_v51 = vand.u32 2147483647, %v401_v54 }
  0x91   : > { %v1636_v12 = vld [vmem:[%s1471_s27 + $0xf8] sm:$0xff]  ;;  %v380_v14 = vld [vmem:[%s1478_s21 + $0xa0] sm:$0xff]  ;;  %v381_v15 = vld [vmem:[%s1478_s21 + $0xa8] sm:$0xff]  ;;  %v408_v16 = vsub.f32 %v1531_v26, %v376_v5  ;;  %v409_v17 = vsub.f32 %v1534_v27, %v377_v6  ;;  %v410_v18 = vsub.f32 %v1537_v28, %v378_v7  ;;  %v1652_v26 = vand.u32 2147483647, %v397_v43 }
  0x92   : > { %v379_v13 = vld [vmem:[%s1478_s21 + $0x98] sm:$0xff]  ;;  %v382_v20 = vld [vmem:[%s1478_s21 + $0xb0] sm:$0xff]  ;;  %v384_v22 = vld [vmem:[%s1478_s21 + $0xc0] sm:$0xff]  ;;  %v412_v24 = vsub.f32 %v1551_v37, %v380_v14  ;;  %v413_v25 = vsub.f32 %v1554_v38, %v381_v15  ;;  %v1689_v52 = vand.u32 2147483647, %v402_v62 }
  0x93   : > { %v383_v21 = vld [vmem:[%s1478_s21 + $0xb8] sm:$0xff]  ;;  %v411_v23 = vsub.f32 %v1548_v36, %v379_v13  ;;  %v385_v27 = vld [vmem:[%s1478_s21 + $0xc8] sm:$0xff]  ;;  %v386_v29 = vld [vmem:[%s1478_s21 + $0xd0] sm:$0xff]  ;;  %v414_v30 = vsub.f32 %v1572_v46, %v382_v20  ;;  %v416_v32 = vsub.f32 %v1578_v48, %v384_v22  ;;  %v1695_v53 = vand.u32 2147483647, %v405_v8 }
  0x94   : > { %v387_v28 = vld [vmem:[%s1478_s21 + $0xd8] sm:$0xff]  ;;  %v415_v31 = vsub.f32 %v1575_v47, %v383_v21  ;;  %v388_v34 = vld [vmem:[%s1478_s21 + $0xe0] sm:$0xff]  ;;  %v389_v36 = vld [vmem:[%s1478_s21 + $0xe8] sm:$0xff]  ;;  %v417_v38 = vsub.f32 %v1599_v56, %v385_v27  ;;  %v418_v39 = vsub.f32 %v1602_v57, %v386_v29  ;;  %v1691_v56 = vand.u32 2147483647, %v403_v63 }
  0x95   : > { %v390_v37 = vld [vmem:[%s1478_s21 + $0xf0] sm:$0xff]  ;;  %v419_v40 = vsub.f32 %v1605_v58, %v387_v28  ;;  %v391_v42 = vld [vmem:[%s1478_s21 + $0xf8] sm:$0xff]  ;;  %v420_v43 = vsub.f32 %v1619_v2, %v388_v34  ;;  %v421_v46 = vsub.f32 %v1622_v3, %v389_v36  ;;  %v1681_v48 = vld [vmem:[%s1678_s24] sm:$0xff]  ;;  %v1693_v57 = vand.u32 2147483647, %v404_v0  ;;  %1879 = vst [vmem:[#allocation20_spill] sm:$0xff] %v1695_v53 }
  0x96   : > { %v422_v47 = vsub.f32 %v1625_v4, %v390_v37  ;;  %v1684_v49 = vld [vmem:[%s1678_s24 + $0x8] sm:$0xff]  ;;  %v423_v50 = vsub.f32 %v1636_v12, %v391_v42  ;;  %v1697_v58 = vand.u32 2147483647, %v406_v9  ;;  %v496_v59 = vunpack.c.0.s8 %v1681_v48  ;;  %v490_v20 = vld [vmem:[%s1678_s24 + $0x10] sm:$0xff]  ;;  %v491_v21 = vld [vmem:[%s1678_s24 + $0x18] sm:$0xff] }
  0x97   : > { %1878 = vst [vmem:[#allocation19_spill] sm:$0xff] %v1693_v57  ;;  %v1700_v60 = vand.u32 2147483647, %v407_v10  ;;  %v1702_v61 = vand.u32 2147483647, %v408_v16  ;;  %v497_v54 = vunpack.c.0.s8 %v1684_v49  ;;  %v504_v3 = vunpack.c.1.s8 %v1681_v48  ;;  %v494_v27 = vld [vmem:[%s1678_s24 + $0x30] sm:$0xff] }
  0x98   : > { %1880 = vst [vmem:[#allocation21_spill] sm:$0xff] %v1697_v58  ;;  %v1704_v2 = vand.u32 2147483647, %v409_v17  ;;  %v1707_v62 = vand.u32 2147483647, %v410_v18  ;;  %v505_v7 = vunpack.c.1.s8 %v1684_v49  ;;  %v512_v12 = vunpack.c.2.s8 %v1681_v48 }
  0x99   : > { %1881 = vst [vmem:[#allocation22_spill] sm:$0xff] %v1700_v60  ;;  %1882 = vst [vmem:[#allocation23_spill] sm:$0xff] %v1702_v61  ;;  %v1709_v63 = vand.u32 2147483647, %v411_v23  ;;  %v1711_v0 = vand.u32 2147483647, %v412_v24  ;;  %v513_v16 = vunpack.c.2.s8 %v1684_v49  ;;  %v520_v22 = vunpack.c.3.s8 %v1681_v48 }
  0x9a   : > { %1883 = vst [vmem:[#allocation24_spill] sm:$0xff] %v1704_v2  ;;  %1884 = vst [vmem:[#allocation25_spill] sm:$0xff] %v1707_v62  ;;  %v1714_v4 = vand.u32 2147483647, %v413_v25  ;;  %v1716_v5 = vand.u32 2147483647, %v414_v30  ;;  %v521_v23 = vunpack.c.3.s8 %v1684_v49  ;;  %v498_v29 = vunpack.c.0.s8 %v490_v20 }
  0x9b   : > { %1885 = vst [vmem:[#allocation26_spill] sm:$0xff] %v1709_v63  ;;  %1886 = vst [vmem:[#allocation27_spill] sm:$0xff] %v1711_v0  ;;  %v1718_v6 = vand.u32 2147483647, %v415_v31  ;;  %v1721_v8 = vand.u32 2147483647, %v416_v32  ;;  %v499_v28 = vunpack.c.0.s8 %v491_v21  ;;  %v506_v30 = vunpack.c.1.s8 %v490_v20 }
  0x9c   : > { %1887 = vst [vmem:[#allocation28_spill] sm:$0xff] %v1714_v4  ;;  %1888 = vst [vmem:[#allocation29_spill] sm:$0xff] %v1716_v5  ;;  %v1723_v9 = vand.u32 2147483647, %v417_v38  ;;  %v1725_v10 = vand.u32 2147483647, %v418_v39  ;;  %v507_v31 = vunpack.c.1.s8 %v491_v21  ;;  %v502_v37 = vunpack.c.0.s8 %v494_v27 }
  0x9d   : > { %1889 = vst [vmem:[#allocation30_spill] sm:$0xff] %v1718_v6  ;;  %1890 = vst [vmem:[#allocation31_spill] sm:$0xff] %v1721_v8  ;;  %v1728_v13 = vand.u32 2147483647, %v419_v40  ;;  %v1730_v14 = vand.u32 2147483647, %v420_v43  ;;  %v510_v42 = vunpack.c.1.s8 %v494_v27  ;;  %v529_v8 = vcvt.s32.f32 %v497_v54 }
  0x9e   : > { %1891 = vst [vmem:[#allocation32_spill] sm:$0xff] %v1723_v9  ;;  %1892 = vst [vmem:[#allocation33_spill] sm:$0xff] %v1725_v10  ;;  %v1732_v15 = vand.u32 2147483647, %v421_v46  ;;  %v1735_v17 = vand.u32 2147483647, %v422_v47  ;;  %v514_v46 = vunpack.c.2.s8 %v490_v20  ;;  %v515_v47 = vunpack.c.2.s8 %v491_v21 }
  0x9f   : > { %1893 = vst [vmem:[#allocation34_spill] sm:$0xff] %v1728_v13  ;;  %1894 = vst [vmem:[#allocation35_spill] sm:$0xff] %v1730_v14  ;;  %v1737_v18 = vand.u32 2147483647, %v423_v50  ;;  %v492_v24 = vld [vmem:[%s1678_s24 + $0x20] sm:$0xff]  ;;  %v493_v25 = vld [vmem:[%s1678_s24 + $0x28] sm:$0xff]  ;;  %v518_v50 = vunpack.c.2.s8 %v494_v27  ;;  %v526_v13 = vunpack.c.3.s8 %v494_v27  ;;  %v528_v9 = vcvt.s32.f32 %v496_v59 }
  0xa0   : > { %1895 = vst [vmem:[#allocation36_spill] sm:$0xff] %v1732_v15  ;;  %1896 = vst [vmem:[#allocation37_spill] sm:$0xff] %v1735_v17  ;;  %v495_v32 = vld [vmem:[%s1678_s24 + $0x38] sm:$0xff]  ;;  %v500_v34 = vunpack.c.0.s8 %v492_v24  ;;  %v501_v36 = vunpack.c.0.s8 %v493_v25  ;;  %v508_v38 = vunpack.c.1.s8 %v492_v24  ;;  %v509_v40 = vunpack.c.1.s8 %v493_v25 }
  0xa1   : > { %1897 = vst [vmem:[#allocation38_spill] sm:$0xff] %v1737_v18  ;;  %v503_v39 = vunpack.c.0.s8 %v495_v32  ;;  %v511_v43 = vunpack.c.1.s8 %v495_v32  ;;  %v516_v48 = vunpack.c.2.s8 %v492_v24  ;;  %v517_v49 = vunpack.c.2.s8 %v493_v25 }
  0xa2   : > { %v519_v35 = vunpack.c.2.s8 %v495_v32  ;;  %v522_v18 = vunpack.c.3.s8 %v490_v20  ;;  %v523_v17 = vunpack.c.3.s8 %v491_v21  ;;  %v524_v15 = vunpack.c.3.s8 %v492_v24 }
  0xa3   : > { %v525_v14 = vunpack.c.3.s8 %v493_v25  ;;  %v527_v10 = vunpack.c.3.s8 %v495_v32  ;;  %v530_v6 = vcvt.s32.f32 %v498_v29  ;;  %v531_v5 = vcvt.s32.f32 %v499_v28 }
  0xa4   : > { %v532_v4 = vcvt.s32.f32 %v500_v34  ;;  %v533_v0 = vcvt.s32.f32 %v501_v36  ;;  %v534_v63 = vcvt.s32.f32 %v502_v37  ;;  %v535_v62 = vcvt.s32.f32 %v503_v39 }
  0xa5   : > { %v536_v2 = vcvt.s32.f32 %v504_v3  ;;  %v537_v61 = vcvt.s32.f32 %v505_v7  ;;  %v538_v60 = vcvt.s32.f32 %v506_v30  ;;  %v539_v58 = vcvt.s32.f32 %v507_v31 }
  0xa6   : > { %v540_v53 = vcvt.s32.f32 %v508_v38  ;;  %v541_v57 = vcvt.s32.f32 %v509_v40  ;;  %v542_v20 = vcvt.s32.f32 %v510_v42  ;;  %v543_v21 = vcvt.s32.f32 %v511_v43  ;;  %v1912_v43 = vld [vmem:[#allocation33_spill] sm:$0xff] }
  0xa7   : > { %v544_v24 = vcvt.s32.f32 %v512_v12  ;;  %v545_v25 = vcvt.s32.f32 %v513_v16  ;;  %v546_v27 = vcvt.s32.f32 %v514_v46  ;;  %v547_v32 = vcvt.s32.f32 %v515_v47  ;;  %v1913_v47 = vld [vmem:[#allocation34_spill] sm:$0xff] }
  0xa8   : > { %v548_v59 = vcvt.s32.f32 %v516_v48  ;;  %v549_v54 = vcvt.s32.f32 %v517_v49  ;;  %v550_v29 = vcvt.s32.f32 %v518_v50  ;;  %v551_v28 = vcvt.s32.f32 %v519_v35  ;;  %v1914_v49 = vld [vmem:[#allocation35_spill] sm:$0xff] }
  0xa9   : > { %v552_v34 = vcvt.s32.f32 %v520_v22  ;;  %v553_v36 = vcvt.s32.f32 %v521_v23  ;;  %v554_v37 = vcvt.s32.f32 %v522_v18  ;;  %v555_v39 = vcvt.s32.f32 %v523_v17  ;;  %v1911_v18 = vld [vmem:[#allocation32_spill] sm:$0xff] }
  0xaa   : > { %v556_v3 = vcvt.s32.f32 %v524_v15  ;;  %v557_v7 = vcvt.s32.f32 %v525_v14  ;;  %v558_v30 = vcvt.s32.f32 %v526_v13  ;;  %v559_v31 = vcvt.s32.f32 %v527_v10  ;;  %v1910_v13 = vld [vmem:[#allocation31_spill] sm:$0xff] }
  0xab   : > { %v560_v38 = vmul.f32 %v528_v9, %v1569_v45  ;;  %v561_v40 = vmul.f32 %v529_v8, %v1595_v55  ;;  %v562_v12 = vmul.f32 %v530_v6, %v1616_v1  ;;  %v563_v16 = vmul.f32 %v531_v5, %v1633_v11  ;;  %v1898_v8 = vld [vmem:[#allocation19_spill] sm:$0xff]  ;;  %v1899_v6 = vld [vmem:[#allocation20_spill] sm:$0xff]  ;;  %v1900_v5 = vld [vmem:[#allocation21_spill] sm:$0xff] }
  0xac   : > { %v564_v42 = vmul.f32 %v532_v4, %v1644_v19  ;;  %v565_v35 = vmul.f32 %v533_v0, %v1652_v26  ;;  %v566_v22 = vmul.f32 %v534_v63, %v1660_v33  ;;  %v567_v17 = vmul.f32 %v535_v62, %v1668_v41  ;;  %v1901_v4 = vld [vmem:[#allocation22_spill] sm:$0xff]  ;;  %v1902_v0 = vld [vmem:[#allocation23_spill] sm:$0xff]  ;;  %v1903_v63 = vld [vmem:[#allocation24_spill] sm:$0xff] }
  0xad   : > { %v568_v14 = vmul.f32 %v536_v2, %v1674_v44  ;;  %v569_v10 = vmul.f32 %v537_v61, %v1687_v51  ;;  %v570_v45 = vmul.f32 %v538_v60, %v1689_v52  ;;  %v571_v55 = vmul.f32 %v539_v58, %v1691_v56  ;;  %v1904_v62 = vld [vmem:[#allocation25_spill] sm:$0xff]  ;;  %v1905_v2 = vld [vmem:[#allocation26_spill] sm:$0xff]  ;;  %v1906_v61 = vld [vmem:[#allocation27_spill] sm:$0xff] }
  0xae   : > { %v572_v1 = vmul.f32 %v540_v53, %v1898_v8  ;;  %v573_v11 = vmul.f32 %v541_v57, %v1899_v6  ;;  %v574_v19 = vmul.f32 %v542_v20, %v1900_v5  ;;  %v575_v26 = vmul.f32 %v543_v21, %v1901_v4  ;;  %v1907_v60 = vld [vmem:[#allocation28_spill] sm:$0xff]  ;;  %v1908_v58 = vld [vmem:[#allocation29_spill] sm:$0xff]  ;;  %v1909_v9 = vld [vmem:[#allocation30_spill] sm:$0xff] }
  0xaf   : > { %v576_v33 = vmul.f32 %v544_v24, %v1902_v0  ;;  %v577_v41 = vmul.f32 %v545_v25, %v1903_v63  ;;  %v578_v44 = vmul.f32 %v546_v27, %v1904_v62  ;;  %v579_v51 = vmul.f32 %v547_v32, %v1905_v2  ;;  %v1915_v20 = vld [vmem:[#allocation36_spill] sm:$0xff]  ;;  %v1916_v24 = vld [vmem:[#allocation37_spill] sm:$0xff]  ;;  %v1917_v27 = vld [vmem:[#allocation38_spill] sm:$0xff] }
  0xb0   : > { %v580_v52 = vmul.f32 %v548_v59, %v1906_v61  ;;  %v581_v56 = vmul.f32 %v549_v54, %v1907_v60  ;;  %v582_v53 = vmul.f32 %v550_v29, %v1908_v58  ;;  %v583_v57 = vmul.f32 %v551_v28, %v1909_v9 }
  0xb1   : > { %v584_v15 = vmul.f32 %v552_v34, %v1910_v13  ;;  %v585_v23 = vmul.f32 %v553_v36, %v1911_v18  ;;  %v586_v46 = vmul.f32 %v554_v37, %v1912_v43  ;;  %v587_v48 = vmul.f32 %v555_v39, %v1913_v47 }
  0xb2   : > { %v588_v50 = vmul.f32 %v556_v3, %v1914_v49  ;;  %v589_v21 = vmul.f32 %v557_v7, %v1915_v20  ;;  %v590_v25 = vmul.f32 %v558_v30, %v1916_v24  ;;  %v591_v32 = vmul.f32 %v559_v31, %v1917_v27 }
  0xb3   : > { %v691_v59 = vadd.f32 %v568_v14, %v560_v38  ;;  %v700_v54 = vadd.f32 %v569_v10, %v561_v40  ;;  %v709_v29 = vadd.f32 %v570_v45, %v562_v12  ;;  %v718_v28 = vadd.f32 %v571_v55, %v563_v16 }
  0xb4   : > { %v727_v8 = vadd.f32 %v572_v1, %v564_v42  ;;  %v736_v34 = vadd.f32 %v573_v11, %v565_v35  ;;  %v745_v6 = vadd.f32 %v574_v19, %v566_v22  ;;  %v754_v36 = vadd.f32 %v575_v26, %v567_v17 }
  0xb5   : > { %v692_v5 = vadd.f32 %v691_v59, %v576_v33  ;;  %v701_v37 = vadd.f32 %v700_v54, %v577_v41  ;;  %v710_v4 = vadd.f32 %v709_v29, %v578_v44  ;;  %v719_v39 = vadd.f32 %v718_v28, %v579_v51 }
  0xb6   : > { %v728_v0 = vadd.f32 %v727_v8, %v580_v52  ;;  %v737_v3 = vadd.f32 %v736_v34, %v581_v56  ;;  %v746_v63 = vadd.f32 %v745_v6, %v582_v53  ;;  %v755_v7 = vadd.f32 %v754_v36, %v583_v57 }
  0xb7   : > { %v693_v62 = vadd.f32 %v692_v5, %v584_v15  ;;  %v702_v30 = vadd.f32 %v701_v37, %v585_v23  ;;  %v711_v2 = vadd.f32 %v710_v4, %v586_v46  ;;  %v720_v31 = vadd.f32 %v719_v39, %v587_v48 }
  0xb8   : > { %v729_v38 = vadd.f32 %v728_v0, %v588_v50  ;;  %v738_v40 = vadd.f32 %v737_v3, %v589_v21  ;;  %v747_v12 = vadd.f32 %v746_v63, %v590_v25  ;;  %v756_v16 = vadd.f32 %v755_v7, %v591_v32  ;;  %v1918_v0 = vld [vmem:[#allocation18_spill] sm:$0xff] }
  0xb9   : > { %v694_v42 = vrot.slane %v693_v62, 4  ;;  %v703_v35 = vrot.slane %v702_v30, 4  ;;  %v712_v22 = vrot.slane %v711_v2, 4  ;;  %v721_v17 = vrot.slane %v720_v31, 4 }
  0xba   : > { %v730_v14 = vrot.slane %v729_v38, 4  ;;  %v739_v10 = vrot.slane %v738_v40, 4  ;;  %v748_v45 = vrot.slane %v747_v12, 4  ;;  %v757_v55 = vrot.slane %v756_v16, 4 }
  0xbb   : > { %v695_v1 = vadd.f32 %v694_v42, %v693_v62  ;;  %v704_v11 = vadd.f32 %v703_v35, %v702_v30  ;;  %v713_v19 = vadd.f32 %v712_v22, %v711_v2  ;;  %v722_v26 = vadd.f32 %v721_v17, %v720_v31 }
  0xbc   : > { %v731_v33 = vadd.f32 %v730_v14, %v729_v38  ;;  %v740_v41 = vadd.f32 %v739_v10, %v738_v40  ;;  %v749_v44 = vadd.f32 %v748_v45, %v747_v12  ;;  %v758_v51 = vadd.f32 %v757_v55, %v756_v16 }
  0xbd   : > { %v696_v61 = vrot.slane %v695_v1, 2  ;;  %v705_v52 = vrot.slane %v704_v11, 2  ;;  %v714_v60 = vrot.slane %v713_v19, 2  ;;  %v723_v56 = vrot.slane %v722_v26, 2 }
  0xbe   : > { %v732_v58 = vrot.slane %v731_v33, 2  ;;  %v741_v53 = vrot.slane %v740_v41, 2  ;;  %v750_v9 = vrot.slane %v749_v44, 2  ;;  %v759_v57 = vrot.slane %v758_v51, 2 }
  0xbf   : > { %v697_v13 = vadd.f32 %v696_v61, %v695_v1  ;;  %v706_v15 = vadd.f32 %v705_v52, %v704_v11  ;;  %v715_v18 = vadd.f32 %v714_v60, %v713_v19  ;;  %v724_v23 = vadd.f32 %v723_v56, %v722_v26 }
  0xc0   : > { %v733_v43 = vadd.f32 %v732_v58, %v731_v33  ;;  %v742_v46 = vadd.f32 %v741_v53, %v740_v41  ;;  %v751_v47 = vadd.f32 %v750_v9, %v749_v44  ;;  %v760_v48 = vadd.f32 %v759_v57, %v758_v51 }
  0xc1   : > { %v698_v49 = vrot.slane %v697_v13, 1  ;;  %v707_v50 = vrot.slane %v706_v15, 1  ;;  %v716_v20 = vrot.slane %v715_v18, 1  ;;  %v725_v21 = vrot.slane %v724_v23, 1 }
  0xc2   : > { %v734_v24 = vrot.slane %v733_v43, 1  ;;  %v743_v25 = vrot.slane %v742_v46, 1  ;;  %v752_v27 = vrot.slane %v751_v47, 1  ;;  %v761_v32 = vrot.slane %v760_v48, 1 }
  0xc3   : > { %v699_v59 = vadd.f32 %v698_v49, %v697_v13  ;;  %v708_v54 = vadd.f32 %v707_v50, %v706_v15  ;;  %v717_v29 = vadd.f32 %v716_v20, %v715_v18  ;;  %v726_v28 = vadd.f32 %v725_v21, %v724_v23 }
  0xc4   : > { %v735_v8 = vadd.f32 %v734_v24, %v733_v43  ;;  %v744_v34 = vadd.f32 %v743_v25, %v742_v46  ;;  %v753_v6 = vadd.f32 %v752_v27, %v751_v47  ;;  %v762_v36 = vadd.f32 %v761_v32, %v760_v48 }
  0xc5   : > { %v771_v5 = vcombine.low %v699_v59, %v708_v54  ;;  %v772_v37 = vcombine.low %v717_v29, %v726_v28 }
  0xc6   : > { %v773_v4 = vcombine.low %v735_v8, %v744_v34  ;;  %v774_v39 = vcombine.low %v753_v6, %v762_v36 }
  0xc7   : > { %v781_v3 = vrot.slane %v771_v5, %v1918_v0  ;;  %v788_v63 = vrot.slane %v772_v37, %v1918_v0 }
  0xc8   : > { %v795_v7 = vrot.slane %v773_v4, %v1918_v0  ;;  %v802_v62 = vrot.slane %v774_v39, %v1918_v0 }
  0xc9   : > { %v803_v30 = vcombine.low %v781_v3, %v788_v63 }
  0xca   : > { %v804_v2 = vcombine.low %v795_v7, %v802_v62 }
  0xcb   : > { %v811_v31 = vrot.slane %v803_v30, %v1918_v0 }
  0xcc   : > { %v818_v38 = vrot.slane %v804_v2, %v1918_v0 }
  0xce   : > { %v819_v40 = vcombine.low %v811_v31, %v818_v38 }
  0xd0   : > { %821 = vst [vmem:[%s286_s19] sm:$0xff] %v819_v40 }
  0xd1   : > { %1170 = shalt.err (!%p1167_p13)
}
  0xd2   : > { %s1171_s28 = scalar_lea.hbm %s1790_s29, 128  ;;  %s1175_s14 = scalar_lea.hbm %s1842_s3, 256 }
  0xd3   : > { %p1172_p11 = scmp.ne.s32.totalorder %s1790_s29, %s1171_s28  ;;  %p1176_p7 = scmp.lt.u32.totalorder %s1790_s29, %s1842_s3 }
  0xd4   : > { %p1177_p3 = scmp.lt.u32.totalorder %s1175_s14, %s1171_s28  ;;  %p1179_p0 = scmp.lt.u32.totalorder %s1171_s28, %s1790_s29 }
  0xd5   : > { %p1173_p2 = pnand %p1172_p11, %p1919_p10 }
  0xd6   : > { %p1178_p4 = por %p1177_p3, %p1176_p7 }
  0xd7   : > { %p1174_p5 = pneg %p1173_p2 }
  0xd8   : > { %p1180_p8 = por %p1179_p0, %p1178_p4 }
  0xda   : > { %p1181_p9 = pnand %p1180_p8, %p1174_p5 }
  0xdc   : > { %1184 = shalt.err (!%p1181_p9)
}
  0xdd   : > { %998 = dma.vmem_to_hbm [thread:$0]  (%p1919_p10), %s1792_s5, 128, %s1790_s29, %s823_s6  }
  0xde PF: > { %s1920_s26 = sld [smem:[#allocation17_spill]]  ;;  %s1921_s27 = sld [smem:[#allocation14_spill]] }
  0xdf   : > { %s849_s4 = sand.u32 1, %s1223_s12  }
  0xe0   : > { %s850_s11 = scalar_lea.sflag [#allocation5], %s849_s4 }
  0xe4   : > { %p1922_p12 = scmp.ne.s32.totalorder %s1920_s26, 0  ;;  %p1923_p1 = scmp.ge.s32.totalorder %s1921_s27, 2 }
  0xe6   : > { %p1011_p6 = pnand %p1923_p1, %p1922_p12 }
  0xe8   : > { %1218 = dma.done.wait (!%p1011_p6), %s850_s11, 128  }
  0xe9   : > { %1220 = vsyncadd (!%p1011_p6), %s850_s11, 4294967168  ;;  %s22_s17 = sadd.s32 1, %s1921_s27   ;;  %s1924_s21 = sld [smem:[#allocation13_spill]] }
  0xea   : > { %p19_p13 = scmp.ge.s32.totalorder %s22_s17, 4   ;;  %s1925_s14 = sld [smem:[#allocation16_spill]] }
  0xeb   : > { %s1926_s25 = sld [smem:[#allocation15_spill]]  ;;  %s1927_s12 = smov %s1227_s13 }
  0xec   : > { %s1929_s15 = smov %s1239_s16  ;;  %21 = sbr.rel (!%p19_p13) target bundleno = 11 (0xb), region = 109 }
  0xef   : > { %s1928_s13 = smov %s1924_s21 }
  0xf1   : > { %s1930_s16 = smov %s1926_s25 }
  0xf3   :  { %855 = vsyncpa [#allocation4], 1 }
  0xf4   :  { %857 = vsyncpa [#allocation4 + $0x1], 1 }
  0xf5   :  { %858 = vsyncpa [#allocation7], 1 }
  0xf6   :  { %860 = vsyncpa [#allocation7 + $0x1], 1 }
  0xf7   :  { %861 = vsyncpa [#allocation5], 1 }
  0xf8   :  { %863 = vsyncpa [#allocation5 + $0x1], 1 }

</bundles_post_ra>
